<compile_context>
chip_gen: v5e
topology: v5e:2x2
jax: 0.10.0
libtpu: 0.0.40
codegen_flags: <defaults>
</compile_context>

<pallas_src>
import functools

import jax
import jax.numpy as jnp
import numpy as np
from jax import lax
from jax.experimental import pallas as pl
from jax.experimental.pallas import tpu as pltpu

_NEG = -1e9  # class-column padding for student logits; exp(-1e9 - max) underflows to exact 0


def _round_up(v, m):
    return ((v + m - 1) // m) * m


def _vmem_capacity_bytes():
    try:
        return int(pltpu.get_tpu_info().vmem_capacity_bytes)
    except Exception:
        return 64 << 20  # conservative fallback: v7x per-TensorCore VMEM


def _vmem_bytes_estimate(tile_m, d_p, h_p, c_p, x_itemsize):
    """Rough per-kernel VMEM footprint.  Weights counted twice: Pallas allocates
    two buffers per BlockSpec even for constant index maps."""
    weights = 2 * 4 * (d_p * h_p + h_p * c_p + h_p + c_p)
    streams = 2 * tile_m * (d_p * x_itemsize + c_p * 4)   # pipelined x / p_tgt tiles
    outs = 2 * 8 * c_p * 4                                # per-tile partial blocks
    interm = 4 * tile_m * (h_p + 4 * c_p)                 # h, logits, p_hat, diff/se
    return weights + streams + outs + interm


def _pick_tile_m(tile_m, m, d_p, h_p, c_p, x_itemsize, budget):
    if tile_m is not None:
        return _round_up(max(int(tile_m), 1), 8)
    if m <= 256:                       # small batch: one sublane-aligned tile
        return _round_up(m, 8)
    for cand in (512, 384, 256, 128):  # MXU-height multiples of 128, largest that fits
        if _vmem_bytes_estimate(cand, d_p, h_p, c_p, x_itemsize) <= budget:
            return cand
    # TODO(synk): K-tile over D_p (second grid axis / emit_pipeline with an h
    #             accumulator) when even a 128-row tile + resident w1 overflows VMEM.
    return 128


def pimodel_kernel(x_ref, w1_ref, b1_ref, w2_ref, b2_ref, pt_ref, out_ref,
                   *, tile_m, m_true, mask_rows):
    i = pl.program_id(0)

    # --- student forward on this row tile: dense -> relu -> dense -> logits ---
    x = x_ref[...]                                                     # (TILE_M, D_p)
    h = jnp.dot(x, w1_ref[...], preferred_element_type=jnp.float32)   # (TILE_M, H_p)
    h = jnp.maximum(h + b1_ref[...].astype(jnp.float32), 0.0)
    logits = jnp.dot(h, w2_ref[...], preferred_element_type=jnp.float32)
    logits = logits + b2_ref[...].astype(jnp.float32)                  # (TILE_M, C_p)

    # student softmax; padded class columns sit at -1e9 -> exp underflows to exact 0
    z = logits - jnp.max(logits, axis=1, keepdims=True)
    e = jnp.exp(z)
    p_hat = e * pl.reciprocal(jnp.sum(e, axis=1, keepdims=True), approx=False)

    # teacher probabilities are pre-softmaxed & zero-padded in the wrapper
    diff = p_hat - pt_ref[...]
    se = diff * diff                                                   # (TILE_M, C_p)

    # fold rows into an (8, C_p) partial with pure VPU adds (no cross-lane XLU
    # reduce, unmasked lane-dense store); final sum + 1/(M*C) happen in the wrapper.
    def _fold_rows(v):
        acc = v[0:8, :]
        for k in range(1, tile_m // 8):
            acc = acc + v[k * 8:(k + 1) * 8, :]
        return acc

    out_ref[...] = _fold_rows(se)

    if mask_rows:
        # only the last tile can contain padded rows -> re-write just that tile
        @pl.when(i == pl.num_programs(0) - 1)
        def _mask_tail():
            row_ids = i * tile_m + lax.broadcasted_iota(jnp.int32, (tile_m, 1), 0)
            out_ref[...] = _fold_rows(jnp.where(row_ids < m_true, se, 0.0))


def pi_model_loss(x, y, mask, params, tile_m=None):
    """x: (M, C, H, W) — already-masked student inputs (NCHW, flattened row-major).
       y: (N, num_classes) teacher logits.
       mask: (N,) bool (must be concrete: jnp.nonzero), mask.sum() == M.
       params: synthetic 2-layer MLP (w1 (D,hidden), b1 (hidden,), w2 (hidden,C), b2 (C,))."""
    w1, b1, w2, b2 = params
    M = x.shape[0]
    D = int(np.prod(x.shape[1:]))
    C = y.shape[1]
    hidden = w1.shape[1]

    # lane-dense padded dims (multiples of 128)
    D_p = _round_up(D, 128)
    H_p = _round_up(hidden, 128)
    C_p = _round_up(C, 128)

    x_flat = x.reshape(M, D)
    x_itemsize = int(jnp.dtype(x_flat.dtype).itemsize)

    # generation-aware tile sizing & VMEM budget
    capacity = _vmem_capacity_bytes()
    TILE_M = _pick_tile_m(tile_m, M, D_p, H_p, C_p, x_itemsize, int(0.70 * capacity))
    M_p = _round_up(M, TILE_M)
    n_tiles = M_p // TILE_M

    # --- wrapper-side glue: teacher softmax + boolean row-select, flatten, pad.
    #     x keeps its dtype (pass bf16 x to halve HBM traffic; accumulation stays f32).
    idx = jnp.nonzero(mask)[0]                                    # concrete mask -> static shape
    p_tgt = jax.nn.softmax(jnp.take(y, idx, axis=0).astype(jnp.float32), axis=1)  # (M, C)

    x_p = jnp.zeros((M_p, D_p), x_flat.dtype).at[:M, :D].set(x_flat)
    pt_p = jnp.zeros((M_p, C_p), jnp.float32).at[:M, :C].set(p_tgt)
    w1_p = jnp.zeros((D_p, H_p), w1.dtype).at[:D, :hidden].set(w1)
    b1_p = jnp.zeros((1, H_p), jnp.float32).at[0, :hidden].set(b1.astype(jnp.float32))
    w2_p = jnp.zeros((H_p, C_p), w2.dtype).at[:hidden, :C].set(w2)
    b2_p = jnp.full((1, C_p), _NEG, jnp.float32).at[0, :C].set(b2.astype(jnp.float32))

    kernel = functools.partial(
        pimodel_kernel, tile_m=TILE_M, m_true=M, mask_rows=(M != M_p))

    est = _vmem_bytes_estimate(TILE_M, D_p, H_p, C_p, x_itemsize)
    vmem_limit = int(min(int(0.85 * capacity), max(32 << 20, 2 * est)))

    partials = pl.pallas_call(
        kernel,
        out_shape=jax.ShapeDtypeStruct((n_tiles * 8, C_p), jnp.float32),
        grid_spec=pltpu.PrefetchScalarGridSpec(
            num_scalar_prefetch=0,
            grid=(n_tiles,),
            in_specs=[
                pl.BlockSpec((TILE_M, D_p), lambda i: (i, 0)),   # x tile (pipelined)
                pl.BlockSpec((D_p, H_p), lambda i: (0, 0)),      # w1 (resident)
                pl.BlockSpec((1, H_p), lambda i: (0, 0)),        # b1 (resident)
                pl.BlockSpec((H_p, C_p), lambda i: (0, 0)),      # w2 (resident)
                pl.BlockSpec((1, C_p), lambda i: (0, 0)),        # b2 (resident)
                pl.BlockSpec((TILE_M, C_p), lambda i: (i, 0)),   # teacher probs tile
            ],
            out_specs=pl.BlockSpec((8, C_p), lambda i: (i, 0)),  # per-tile partial sums
        ),
        compiler_params=pltpu.CompilerParams(
            dimension_semantics=("parallel",),   # independent tiles -> megacore-shardable
            vmem_limit_bytes=vmem_limit),
    )(x_p, w1_p, b1_p, w2_p, b2_p, pt_p)

    # final reduction + mean(1).mean() normalization (== sum / (M*C)) in f32
    return jnp.sum(partials) * (1.0 / float(M * C))


def _reference(x, y, mask, params):
    """Pure-JAX reference mirroring the PyTorch forward."""
    w1, b1, w2, b2 = params
    M = x.shape[0]
    x_flat = x.reshape(M, -1)
    h = jnp.maximum(x_flat @ w1 + b1, 0.0)
    logits = h @ w2 + b2
    p_hat = jax.nn.softmax(logits, axis=1)
    p_tgt = jax.nn.softmax(y, axis=1)[jnp.nonzero(mask)[0]]
    return jnp.mean(jnp.mean((p_hat - p_tgt) ** 2, axis=1))


if __name__ == "__main__":
    key = jax.random.PRNGKey(0)
    k_x, k_y, k_w1, k_b1, k_w2, k_b2 = jax.random.split(key, 6)

    # small CIFAR-style shapes; M chosen so the demo exercises multiple row tiles
    # AND a ragged last tile (padded-row masking path).
    N, M = 48, 20                  # full batch, masked batch (mask.sum() == M)
    C_img, H_img, W_img = 3, 8, 8  # NCHW image
    D = C_img * H_img * W_img
    hidden = 32
    num_classes = 100

    x = jax.random.normal(k_x, (M, C_img, H_img, W_img), dtype=jnp.float32)
    y = jax.random.normal(k_y, (N, num_classes), dtype=jnp.float32)
    mask = (jnp.arange(N) % 2 == 0) & (jnp.arange(N) < 2 * M)   # exactly M True rows

    # deterministic synthetic "model" parameters
    w1 = jax.random.normal(k_w1, (D, hidden), dtype=jnp.float32) * 0.05
    b1 = jax.random.normal(k_b1, (hidden,), dtype=jnp.float32) * 0.01
    w2 = jax.random.normal(k_w2, (hidden, num_classes), dtype=jnp.float32) * 0.05
    b2 = jax.random.normal(k_b2, (num_classes,), dtype=jnp.float32) * 0.01
    params = (w1, b1, w2, b2)

    # tile_m=8 -> grid of 3 parallel row tiles (last one ragged): exercises the
    # per-tile partial-sum outputs, pipelining and the pl.when masking path.
    loss = jax.block_until_ready(pi_model_loss(x, y, mask, params, tile_m=8))
    ref = jax.block_until_ready(_reference(x, y, mask, params))
    np.testing.assert_allclose(np.asarray(loss), np.asarray(ref), rtol=1e-4, atol=1e-6)

    print("KERNEL_OK")
</pallas_src>

<mosaic_0001>
module attributes {stable_mosaic.version = 11 : i64} {
  func.func @pimodel_kernel(%arg0: i32, %arg1: memref<8x256xf32, #tpu.memory_space<vmem>>, %arg2: memref<256x128xf32, #tpu.memory_space<vmem>>, %arg3: memref<1x128xf32, #tpu.memory_space<vmem>>, %arg4: memref<128x128xf32, #tpu.memory_space<vmem>>, %arg5: memref<1x128xf32, #tpu.memory_space<vmem>>, %arg6: memref<8x128xf32, #tpu.memory_space<vmem>>, %arg7: memref<8x128xf32, #tpu.memory_space<vmem>>) attributes {dimension_semantics = [#tpu.dimension_semantics<parallel>], iteration_bounds = array<i64: 3>, scalar_prefetch = 0 : i64, scratch_operands = 0 : i64, tpu.core_type = #tpu.core_type<tc>, window_params = [{transform_indices = @transform_0, window_bounds = array<i64: 8, 256>}, {pipeline_mode = #tpu.pipeline_mode<synchronous>, transform_indices = @transform_1, window_bounds = array<i64: 256, 128>}, {pipeline_mode = #tpu.pipeline_mode<synchronous>, transform_indices = @transform_2, window_bounds = array<i64: 1, 128>}, {pipeline_mode = #tpu.pipeline_mode<synchronous>, transform_indices = @transform_3, window_bounds = array<i64: 128, 128>}, {pipeline_mode = #tpu.pipeline_mode<synchronous>, transform_indices = @transform_4, window_bounds = array<i64: 1, 128>}, {transform_indices = @transform_5, window_bounds = array<i64: 8, 128>}, {transform_indices = @transform_6, window_bounds = array<i64: 8, 128>}]} {
    %c0 = arith.constant 0 : index
    %c0_0 = arith.constant 0 : index
    %0 = vector.load %arg1[%c0, %c0_0] : memref<8x256xf32, #tpu.memory_space<vmem>>, vector<8x256xf32>
    %c0_1 = arith.constant 0 : index
    %c0_2 = arith.constant 0 : index
    %1 = vector.load %arg2[%c0_1, %c0_2] : memref<256x128xf32, #tpu.memory_space<vmem>>, vector<256x128xf32>
    %cst = arith.constant dense<0.000000e+00> : vector<8x128xf32>
    %2 = tpu.matmul %0, %1, %cst {dimension_numbers = #tpu.dot_dimension_numbers<[1], [0], [0], [1], [0, 0, 1, 1], [], []>} : vector<8x256xf32>, vector<256x128xf32>, vector<8x128xf32> -> vector<8x128xf32>
    %c0_3 = arith.constant 0 : index
    %c0_4 = arith.constant 0 : index
    %3 = vector.load %arg3[%c0_3, %c0_4] : memref<1x128xf32, #tpu.memory_space<vmem>>, vector<1x128xf32>
    %4 = vector.broadcast %3 : vector<1x128xf32> to vector<8x128xf32>
    %5 = arith.addf %2, %4 : vector<8x128xf32>
    %cst_5 = arith.constant 0.000000e+00 : f32
    %6 = vector.broadcast %cst_5 : f32 to vector<8x128xf32>
    %7 = arith.maximumf %5, %6 : vector<8x128xf32>
    %c0_6 = arith.constant 0 : index
    %c0_7 = arith.constant 0 : index
    %8 = vector.load %arg4[%c0_6, %c0_7] : memref<128x128xf32, #tpu.memory_space<vmem>>, vector<128x128xf32>
    %cst_8 = arith.constant dense<0.000000e+00> : vector<8x128xf32>
    %9 = tpu.matmul %7, %8, %cst_8 {dimension_numbers = #tpu.dot_dimension_numbers<[1], [0], [0], [1], [0, 0, 1, 1], [], []>} : vector<8x128xf32>, vector<128x128xf32>, vector<8x128xf32> -> vector<8x128xf32>
    %c0_9 = arith.constant 0 : index
    %c0_10 = arith.constant 0 : index
    %10 = vector.load %arg5[%c0_9, %c0_10] : memref<1x128xf32, #tpu.memory_space<vmem>>, vector<1x128xf32>
    %11 = vector.broadcast %10 : vector<1x128xf32> to vector<8x128xf32>
    %12 = arith.addf %9, %11 : vector<8x128xf32>
    %cst_11 = arith.constant dense<0xFF800000> : vector<8xf32>
    %13 = vector.multi_reduction <maximumf>, %12, %cst_11 [1] : vector<8x128xf32> to vector<8xf32>
    %14 = vector.shape_cast %13 : vector<8xf32> to vector<8x1xf32>
    %15 = vector.broadcast %14 : vector<8x1xf32> to vector<8x128xf32>
    %16 = arith.subf %12, %15 : vector<8x128xf32>
    %17 = math.exp %16 : vector<8x128xf32>
    %cst_12 = arith.constant dense<0.000000e+00> : vector<8xf32>
    %18 = vector.multi_reduction <add>, %17, %cst_12 [1] : vector<8x128xf32> to vector<8xf32>
    %19 = vector.shape_cast %18 : vector<8xf32> to vector<8x1xf32>
    %20 = tpu.reciprocal %19 : vector<8x1xf32> -> vector<8x1xf32>
    %21 = vector.broadcast %20 : vector<8x1xf32> to vector<8x128xf32>
    %22 = arith.mulf %17, %21 : vector<8x128xf32>
    %c0_13 = arith.constant 0 : index
    %c0_14 = arith.constant 0 : index
    %23 = vector.load %arg6[%c0_13, %c0_14] : memref<8x128xf32, #tpu.memory_space<vmem>>, vector<8x128xf32>
    %24 = arith.subf %22, %23 : vector<8x128xf32>
    %25 = arith.mulf %24, %24 : vector<8x128xf32>
    %c0_15 = arith.constant 0 : index
    %c0_16 = arith.constant 0 : index
    %26 = vector.load %arg7[%c0_15, %c0_16] : memref<8x128xf32, #tpu.memory_space<vmem>>, vector<8x128xf32>
    tpu.vector_store %arg7[%c0_15, %c0_16], %25 {strides = array<i32>} : memref<8x128xf32, #tpu.memory_space<vmem>>, vector<8x128xf32>,
    %c2_i32 = arith.constant 2 : i32
    %27 = arith.cmpi eq, %arg0, %c2_i32 : i32
    %28 = arith.extui %27 : i1 to i32
    %c0_i32 = arith.constant 0 : i32
    %29 = arith.cmpi ne, %28, %c0_i32 : i32
    scf.if %29 {
      %c8_i32 = arith.constant 8 : i32
      %30 = arith.muli %arg0, %c8_i32 : i32
      %31 = tpu.iota {dimensions = array<i32: 0>} : vector<8x1xi32>
      %32 = vector.broadcast %30 : i32 to vector<8x1xi32>
      %33 = arith.addi %32, %31 : vector<8x1xi32>
      %c20_i32 = arith.constant 20 : i32
      %34 = vector.broadcast %c20_i32 : i32 to vector<8x1xi32>
      %35 = arith.cmpi slt, %33, %34 : vector<8x1xi32>
      %cst_17 = arith.constant 0.000000e+00 : f32
      %36 = vector.shape_cast %35 : vector<8x1xi1> to vector<8x1xi1>
      %37 = vector.broadcast %36 : vector<8x1xi1> to vector<8x128xi1>
      %38 = vector.broadcast %cst_17 : f32 to vector<8x128xf32>
      %39 = arith.select %37, %25, %38 : vector<8x128xi1>, vector<8x128xf32>
      %c0_18 = arith.constant 0 : index
      %c0_19 = arith.constant 0 : index
      %40 = vector.load %arg7[%c0_18, %c0_19] : memref<8x128xf32, #tpu.memory_space<vmem>>, vector<8x128xf32>
      tpu.vector_store %arg7[%c0_18, %c0_19], %39 {strides = array<i32>} : memref<8x128xf32, #tpu.memory_space<vmem>>, vector<8x128xf32>,
    } else {
    }
    return
  }
  func.func @transform_0(%arg0: i32) -> (i32, i32) {
    %c0_i32 = arith.constant 0 : i32
    %c0_i32_0 = arith.constant 0 : i32
    return %arg0, %c0_i32 : i32, i32
  }
  func.func @transform_1(%arg0: i32) -> (i32, i32) {
    %c0_i32 = arith.constant 0 : i32
    %c0_i32_0 = arith.constant 0 : i32
    %c0_i32_1 = arith.constant 0 : i32
    return %c0_i32, %c0_i32_0 : i32, i32
  }
  func.func @transform_2(%arg0: i32) -> (i32, i32) {
    %c0_i32 = arith.constant 0 : i32
    %c0_i32_0 = arith.constant 0 : i32
    %c0_i32_1 = arith.constant 0 : i32
    return %c0_i32, %c0_i32_0 : i32, i32
  }
  func.func @transform_3(%arg0: i32) -> (i32, i32) {
    %c0_i32 = arith.constant 0 : i32
    %c0_i32_0 = arith.constant 0 : i32
    %c0_i32_1 = arith.constant 0 : i32
    return %c0_i32, %c0_i32_0 : i32, i32
  }
  func.func @transform_4(%arg0: i32) -> (i32, i32) {
    %c0_i32 = arith.constant 0 : i32
    %c0_i32_0 = arith.constant 0 : i32
    %c0_i32_1 = arith.constant 0 : i32
    return %c0_i32, %c0_i32_0 : i32, i32
  }
  func.func @transform_5(%arg0: i32) -> (i32, i32) {
    %c0_i32 = arith.constant 0 : i32
    %c0_i32_0 = arith.constant 0 : i32
    return %arg0, %c0_i32 : i32, i32
  }
  func.func @transform_6(%arg0: i32) -> (i32, i32) {
    %c0_i32 = arith.constant 0 : i32
    %c0_i32_0 = arith.constant 0 : i32
    return %arg0, %c0_i32 : i32, i32
  }
}

</mosaic_0001>

<bundles_post_ra>
// kernel: tpu_custom_call.1
= control target key start
LH: loop header
LB: loop body
LE: loop exit
PB: predicated region body
PF: predicated region fallthrough
CT: control target
= control target key end

     0   :  { %s1159_s0 = inlined_call_operand.hbm [shape: f32[24,256], index: 0, kind: input, shape index: {}]   ;;  %s1160_s1 = inlined_call_operand.hbm [shape: f32[256,128], index: 1, kind: input, shape index: {}]   ;;  %s1161_s2 = inlined_call_operand.vmem [shape: f32[1,128], index: 2, kind: input, shape index: {}]   ;;  %s1162_s3 = inlined_call_operand.hbm [shape: f32[128,128], index: 3, kind: input, shape index: {}]   ;;  %s1163_s4 = inlined_call_operand.vmem [shape: f32[1,128], index: 4, kind: input, shape index: {}]   ;;  %s1164_s5 = inlined_call_operand.hbm [shape: f32[24,128], index: 5, kind: input, shape index: {}]   ;;  %s1165_s6 = inlined_call_operand.hbm [shape: f32[24,128], index: 6, kind: output, shape index: {}]  }
   0x1   :  { %1167 = sst [smem:[#allocation17_spill]] %s1160_s1 }
   0x2   :  { %1168 = sst [smem:[#allocation18_spill]] %s1162_s3 }
   0x3   :  { %11 = vsyncpa [#allocation3], 0 }
   0x4   :  { %13 = vsyncpa [#allocation3 + $0x1], 0 }
   0x5   :  { %14 = vsyncpa [#allocation6], 0 }
   0x6   :  { %15 = vsyncpa [#allocation9], 0 }
   0x7   :  { %17 = vsyncpa [#allocation9 + $0x1], 0 }
   0x8   :  { %18 = vsyncpa [#allocation4], 0 }
   0x9   :  { %20 = vsyncpa [#allocation4 + $0x1], 0  ;;  %s967_s21 = smov 0   ;;  %s969_s22 = smov 0  }
   0xa   :  { %s971_s23 = smov 0   ;;  %s973_s24 = smov 0  }
   0xb LB: > { %1169 = sst [smem:[#allocation15_spill]] %s922_s23  ;;  %s991_s28 = sadd.s32 4294967295, %s926_s24   ;;  %s926_s24 = sphi %s973_s24, %s1183_s24   ;;  %s922_s23 = sphi %s971_s23, %s1180_s23   ;;  %s918_s22 = sphi %s969_s22, %s1182_s22   ;;  %s914_s21 = sphi %s967_s21, %s1181_s21  }
   0xc   : > { %s1170_s1 = sld [smem:[#allocation17_spill]]  ;;  %p630_p0 = scmp.ge.s32.totalorder %s926_s24, 1 }
   0xd   : > { %p47_p1 = scmp.eq.s32.totalorder %s991_s28, 0  ;;  %p193_p2 = scmp.lt.s32.totalorder %s926_s24, 4 }
   0xe   : > { %s928_s30 = smov [#allocation5]   ;;  %s1172_s3 = sld [smem:[#allocation18_spill]] }
   0xf   : > { %p996_p3 = pnand %p630_p0, %p193_p2  ;;  %s206_s7 = sshll.u32 %s928_s30, 4  ;;  %s207_s7 = int_to_ptr.vmem [resolvable:$true] %s206_s7 }
  0x10   : > { %s929_s11 = smov [#allocation7]   ;;  %s930_s13 = smov 128  }
  0x11   : > { %p666_p4 = pneg %p996_p3  ;;  %s223_s12 = sshll.u32 %s929_s11, 4  ;;  %s224_s12 = int_to_ptr.vmem [resolvable:$true] %s223_s12 }
  0x12   : > { %s204_s27 = sshll.u32 %s1170_s1, 4  ;;  %s931_s14 = smov 8   ;;  %s205_s27 = int_to_ptr.hbm [resolvable:$true] %s204_s27 }
  0x13   : > { %p667_p5 = pnand %p666_p4, %p47_p1  ;;  %s629_s15 = sadd.s32 4294967294, %s926_s24  }
  0x14   : > { %s221_s10 = sshll.u32 %s1172_s3, 4  ;;  %s1009_s16 = sadd.s32 1, %s926_s24   ;;  %s222_s10 = int_to_ptr.hbm [resolvable:$true] %s221_s10 }
  0x15   : > { %669 = dma.hbm_to_vmem [thread:$0]  (!%p667_p5), %s205_s27, 4096, %s207_s7, [#allocation6], %s930_s13, %s930_s13, %s931_s14  }
  0x16   : > { %672 = dma.hbm_to_vmem [thread:$0]  (!%p667_p5), %s222_s10, 2048, %s224_s12, [#allocation6], %s930_s13, %s930_s13, %s931_s14  }
  0x17   : > { %s30_s17 = ssub.s32 %s926_s24, %s1009_s16  ;;  %s33_s18 = sadd.s32 1, %s922_s23 }
  0x18   : > { %p31_p6 = scmp.eq.s32.totalorder %s30_s17, 0  ;;  %p40_p7 = scmp.ne.s32.totalorder %s922_s23, %s918_s22 }
  0x19   : > { %p41_p8 = scmp.eq.s32.totalorder %s926_s24, 0  ;;  %p46_p9 = scmp.ne.s32.totalorder %s918_s22, %s914_s21 }
  0x1a   : > { %s1020_s19 = scalar_select %p31_p6, %s922_s23, %s33_s18  }
  0x1b   : > { %p1022_p10 = por %p41_p8, %p40_p7  ;;  %p1028_p11 = por %p47_p1, %p46_p9 }
  0x1c   : > { %1173 = sst [smem:[#allocation16_spill]] %s1020_s19  ;;  %p180_p12 = scmp.eq.s32.totalorder %s991_s28, 2 }
  0x1d   : > { %p186_p13 = scmp.eq.s32.totalorder %s629_s15, 2  ;;  %p686_p0 = scmp.lt.s32.totalorder %s926_s24, 3 }
  0x1e   : > { %s1035_s26 = sand.u32 1, %s922_s23   ;;  %p1037_p2 = por %p180_p12, %p40_p7 }
  0x1f   : > { %p1041_p4 = por %p186_p13, %p46_p9  ;;  %s634_s7 = sshll.u32 %s1035_s26, 4 }
  0x20   : > { %s651_s8 = sshll.u32 %s926_s24, 4  ;;  %s244_s12 = scalar_lea.vmem [#allocation2], %s634_s7 }
  0x21   : > { %s249_s11 = scalar_lea.hbm %s1159_s0, %s651_s8  ;;  %s253_s13 = sshll.u32 %s244_s12, 4  ;;  %s254_s13 = int_to_ptr.vmem [resolvable:$true] %s253_s13 }
  0x22   : > { %s251_s14 = sshll.u32 %s249_s11, 4  ;;  %p1052_p5 = pnand %p686_p0, %p1022_p10  ;;  %s252_s14 = int_to_ptr.hbm [resolvable:$true] %s251_s14 }
  0x23   : > { %s637_s17 = sshll.u32 %s1035_s26, 3  ;;  %s241_s18 = scalar_lea.sflag [#allocation3], %s1035_s26 }
  0x24   : > { %s792_s1 = sshra.s32 %s252_s14, 4  ;;  %p796_p7 = pneg %p1052_p5  ;;  %s793_s1 = int_to_ptr.hbm [resolvable:$true] %s792_s1 }
  0x25   : > { %s794_s3 = scalar_lea.hbm %s793_s1, 16  ;;  %s799_s8 = scalar_lea.hbm %s1159_s0, 48 }
  0x26   : > { %p795_p6 = scmp.ne.s32.totalorder %s793_s1, %s794_s3  ;;  %p800_p10 = scmp.lt.s32.totalorder %s793_s1, %s1159_s0 }
  0x27   : > { %p801_p12 = scmp.lt.s32.totalorder %s799_s8, %s794_s3 }
  0x28   : > { %p797_p8 = pnand %p796_p7, %p795_p6 }
  0x29   : > { %p802_p13 = por %p801_p12, %p800_p10 }
  0x2a   : > { %p798_p9 = pneg %p797_p8 }
  0x2c   : > { %p803_p0 = pnand %p802_p13, %p798_p9 }
  0x2e   : > { %806 = shalt.err (!%p803_p0)
}
  0x2f   : > { %676 = dma.hbm_to_vmem [thread:$0]  (!%p1052_p5), %s252_s14, 256, %s254_s13, %s241_s18  }
  0x30   : > { %s638_s11 = sshll.u32 %s926_s24, 3  ;;  %s264_s12 = scalar_lea.vmem [#allocation8], %s637_s17 }
  0x31   : > { %s272_s19 = sshll.u32 %s264_s12, 4  ;;  %s268_s20 = scalar_lea.hbm %s1164_s5, %s638_s11  ;;  %s273_s19 = int_to_ptr.vmem [resolvable:$true] %s272_s19 }
  0x32   : > { %s270_s9 = sshll.u32 %s268_s20, 4  ;;  %s261_s1 = scalar_lea.sflag [#allocation9], %s1035_s26  ;;  %s271_s9 = int_to_ptr.hbm [resolvable:$true] %s270_s9 }
  0x33   : > { %s822_s3 = sshra.s32 %s271_s9, 4  ;;  %s829_s17 = scalar_lea.hbm %s1164_s5, 24  ;;  %s823_s3 = int_to_ptr.hbm [resolvable:$true] %s822_s3 }
  0x34   : > { %s824_s8 = scalar_lea.hbm %s823_s3, 8  ;;  %p830_p10 = scmp.lt.s32.totalorder %s823_s3, %s1164_s5 }
  0x35   : > { %p825_p6 = scmp.ne.s32.totalorder %s823_s3, %s824_s8  ;;  %p831_p12 = scmp.lt.s32.totalorder %s829_s17, %s824_s8 }
  0x37   : > { %p827_p8 = pnand %p825_p6, %p796_p7  ;;  %p832_p13 = por %p831_p12, %p830_p10 }
  0x39   : > { %p828_p9 = pneg %p827_p8 }
  0x3b   : > { %p833_p0 = pnand %p832_p13, %p828_p9 }
  0x3d   : > { %836 = shalt.err (!%p833_p0)
}
  0x3e   : > { %679 = dma.hbm_to_vmem [thread:$0]  (!%p1052_p5), %s271_s9, 128, %s273_s19, %s261_s1  }
  0x3f   : > { %281 = sbr.rel (%p996_p3) target bundleno = 663 (0x297), region = 44  ;;  %s1090_s23 = sand.u32 (!%p996_p3), 1, %s918_s22  }
  0x40   : > { %s640_s26 = sshll.u32 (!%p996_p3), %s1090_s23, 4  ;;  %s284_s11 = scalar_lea.sflag (!%p996_p3), [#allocation3], %s1090_s23 }
  0x41   : > { %s1094_s12 = scalar_lea.vmem (!%p996_p3), [#allocation2], %s640_s26 }
  0x44   : > { %897 = dma.done.wait (%p1028_p11), %s284_s11, 256  }
  0x45   : > { %899 = vsyncadd (%p1028_p11), %s284_s11, 4294967040 }
  0x46   : > { %901 = dma.done.wait (%p47_p1), [#allocation6], 6144  }
  0x47   : > { %903 = vsyncadd (%p47_p1), [#allocation6], 4294961152  ;;  %s643_s29 = sshll.u32 %s1090_s23, 3  ;;  %s304_s19 = scalar_lea.sflag [#allocation9], %s1090_s23 }
  0x48   : > { %s1108_s15 = scalar_lea.vmem [#allocation8], %s643_s29 }
  0x49   : > { %905 = dma.done.wait (%p1028_p11), %s304_s19, 128  }
  0x4a   : > { %907 = vsyncadd (%p1028_p11), %s304_s19, 4294967168  ;;  %v359_v0 = vld [vmem:[#allocation5 + $0x78] sm:$0xff]  ;;  %v358_v1 = vld [vmem:[#allocation5 + $0x70] sm:$0xff]  ;;  %s341_s1 = scalar_lea.vmem [#allocation10], %s643_s29  ;;  %p645_p1 = scmp.ne.s32.totalorder %s991_s28, 2 }
  0x4b   : > { %v375_v2 = vld [vmem:[#allocation5 + $0xf8] sm:$0xff]  ;;  %380 = vmatpush.msra.mxu0 %v359_v0  ;;  %v374_v3 = vld [vmem:[#allocation5 + $0xf0] sm:$0xff]  ;;  %v357_v4 = vld [vmem:[#allocation5 + $0x68] sm:$0xff]  ;;  %s646_s3 = sshll.u32 (!%p645_p1), %s991_s28, 3 }
  0x4c   : > { %400 = vmatpush.msra.mxu1 %v375_v2  ;;  %v373_v5 = vld [vmem:[#allocation5 + $0xe8] sm:$0xff]  ;;  %v356_v6 = vld [vmem:[#allocation5 + $0x60] sm:$0xff]  ;;  %v355_v8 = vld [vmem:[#allocation5 + $0x58] sm:$0xff] }
  0x4d   : > { %381 = vmatpush.msra.mxu0 %v358_v1  ;;  %v372_v7 = vld [vmem:[#allocation5 + $0xe0] sm:$0xff]  ;;  %v371_v9 = vld [vmem:[#allocation5 + $0xd8] sm:$0xff]  ;;  %v354_v10 = vld [vmem:[#allocation5 + $0x50] sm:$0xff] }
  0x4e   : > { %401 = vmatpush.msra.mxu1 %v374_v3  ;;  %v370_v11 = vld [vmem:[#allocation5 + $0xd0] sm:$0xff]  ;;  %v353_v12 = vld [vmem:[#allocation5 + $0x48] sm:$0xff]  ;;  %v436_v14 = vld [vmem:[#allocation7 + $0x78] sm:$0xff] }
  0x4f   : > { %382 = vmatpush.msra.mxu0 %v357_v4  ;;  %v369_v13 = vld [vmem:[#allocation5 + $0xc8] sm:$0xff]  ;;  %v435_v15 = vld [vmem:[#allocation7 + $0x70] sm:$0xff]  ;;  %v352_v16 = vld [vmem:[#allocation5 + $0x40] sm:$0xff]  ;;  %441 = vmatpush.msra.mxu2 %v436_v14 }
  0x50   : > { %402 = vmatpush.msra.mxu1 %v373_v5  ;;  %v368_v17 = vld [vmem:[#allocation5 + $0xc0] sm:$0xff]  ;;  %v434_v18 = vld [vmem:[#allocation7 + $0x68] sm:$0xff]  ;;  %v351_v19 = vld [vmem:[#allocation5 + $0x38] sm:$0xff] }
  0x51   : > { %383 = vmatpush.msra.mxu0 %v356_v6  ;;  %v367_v20 = vld [vmem:[#allocation5 + $0xb8] sm:$0xff]  ;;  %442 = vmatpush.msra.mxu2 %v435_v15  ;;  %v433_v21 = vld [vmem:[#allocation7 + $0x60] sm:$0xff]  ;;  %v350_v22 = vld [vmem:[#allocation5 + $0x30] sm:$0xff] }
  0x52   : > { %403 = vmatpush.msra.mxu1 %v372_v7  ;;  %v366_v23 = vld [vmem:[#allocation5 + $0xb0] sm:$0xff]  ;;  %v432_v24 = vld [vmem:[#allocation7 + $0x58] sm:$0xff]  ;;  %v349_v25 = vld [vmem:[#allocation5 + $0x28] sm:$0xff] }
  0x53   : > { %384 = vmatpush.msra.mxu0 %v355_v8  ;;  %443 = vmatpush.msra.mxu2 %v434_v18  ;;  %v365_v26 = vld [vmem:[#allocation5 + $0xa8] sm:$0xff]  ;;  %v431_v27 = vld [vmem:[#allocation7 + $0x50] sm:$0xff]  ;;  %v348_v28 = vld [vmem:[#allocation5 + $0x20] sm:$0xff] }
  0x54   : > { %404 = vmatpush.msra.mxu1 %v371_v9  ;;  %v364_v29 = vld [vmem:[#allocation5 + $0xa0] sm:$0xff]  ;;  %v430_v30 = vld [vmem:[#allocation7 + $0x48] sm:$0xff]  ;;  %v347_v31 = vld [vmem:[#allocation5 + $0x18] sm:$0xff] }
  0x55   : > { %385 = vmatpush.msra.mxu0 %v354_v10  ;;  %444 = vmatpush.msra.mxu2 %v433_v21  ;;  %v363_v32 = vld [vmem:[#allocation5 + $0x98] sm:$0xff]  ;;  %v429_v33 = vld [vmem:[#allocation7 + $0x40] sm:$0xff]  ;;  %v346_v34 = vld [vmem:[#allocation5 + $0x10] sm:$0xff] }
  0x56   : > { %405 = vmatpush.msra.mxu1 %v370_v11  ;;  %v362_v35 = vld [vmem:[#allocation5 + $0x90] sm:$0xff]  ;;  %v428_v36 = vld [vmem:[#allocation7 + $0x38] sm:$0xff]  ;;  %v345_v37 = vld [vmem:[#allocation5 + $0x8] sm:$0xff] }
  0x57   : > { %386 = vmatpush.msra.mxu0 %v353_v12  ;;  %445 = vmatpush.msra.mxu2 %v432_v24  ;;  %v361_v38 = vld [vmem:[#allocation5 + $0x88] sm:$0xff]  ;;  %v427_v39 = vld [vmem:[#allocation7 + $0x30] sm:$0xff]  ;;  %v344_v40 = vld [vmem:[#allocation5] sm:$0xff] }
  0x58   : > { %406 = vmatpush.msra.mxu1 %v369_v13  ;;  %v360_v41 = vld [vmem:[#allocation5 + $0x80] sm:$0xff]  ;;  %v343_v43 = vld [vmem:[%s1094_s12 + $0x8] sm:$0xff]  ;;  %v423_v47 = vld [vmem:[#allocation7 + $0x10] sm:$0xff] }
  0x59   : > { %387 = vmatpush.msra.mxu0 %v352_v16  ;;  %446 = vmatpush.msra.mxu2 %v431_v27  ;;  %v342_v42 = vld [vmem:[%s1094_s12] sm:$0xff]  ;;  %v426_v44 = vld [vmem:[#allocation7 + $0x28] sm:$0xff]  ;;  %v424_v46 = vld [vmem:[#allocation7 + $0x18] sm:$0xff] }
  0x5a   : > { %407 = vmatpush.msra.mxu1 %v368_v17  ;;  %v425_v45 = vld [vmem:[#allocation7 + $0x20] sm:$0xff]  ;;  %v422_v48 = vld [vmem:[#allocation7 + $0x8] sm:$0xff] }
  0x5b   : > { %388 = vmatpush.msra.mxu0 %v351_v19  ;;  %447 = vmatpush.msra.mxu2 %v430_v30  ;;  %v421_v49 = vld [vmem:[#allocation7] sm:$0xff] }
  0x5c   : > { %408 = vmatpush.msra.mxu1 %v367_v20  ;;  %v726_v50 = vld [vmem:[%s1161_s2] ss:$0 sm:$0xff] }
  0x5d   : > { %389 = vmatpush.msra.mxu0 %v350_v22  ;;  %448 = vmatpush.msra.mxu2 %v429_v33  ;;  %v727_v56 = vld [vmem:[%s1163_s4] ss:$0 sm:$0xff] }
  0x5e   : > { %409 = vmatpush.msra.mxu1 %v366_v23  ;;  %v483_v9 = vld [vmem:[%s1108_s15] sm:$0xff] }
  0x5f   : > { %390 = vmatpush.msra.mxu0 %v349_v25  ;;  %449 = vmatpush.msra.mxu2 %v428_v36 }
  0x60   : > { %410 = vmatpush.msra.mxu1 %v365_v26 }
  0x61   : > { %391 = vmatpush.msra.mxu0 %v348_v28  ;;  %450 = vmatpush.msra.mxu2 %v427_v39 }
  0x62   : > { %411 = vmatpush.msra.mxu1 %v364_v29 }
  0x63   : > { %392 = vmatpush.msra.mxu0 %v347_v31  ;;  %451 = vmatpush.msra.mxu2 %v426_v44 }
  0x64   : > { %412 = vmatpush.msra.mxu1 %v363_v32 }
  0x65   : > { %393 = vmatpush.msra.mxu0 %v346_v34  ;;  %452 = vmatpush.msra.mxu2 %v425_v45 }
  0x66   : > { %413 = vmatpush.msra.mxu1 %v362_v35 }
  0x67   : > { %394 = vmatpush.msra.mxu0 %v345_v37  ;;  %453 = vmatpush.msra.mxu2 %v424_v46 }
  0x68   : > { %414 = vmatpush.msra.mxu1 %v361_v38 }
  0x69   : > { %395 = vmatpush.msra.mxu0 %v344_v40  ;;  %454 = vmatpush.msra.mxu2 %v423_v47 }
  0x6a   : > { %415 = vmatpush.msra.mxu1 %v360_v41  ;;  %396 = vmatmul.f32.vlgmr.msra.gmra.mxu0 %v342_v42 }
  0x6b   : > { %416 = vmatmul.f32.vlgmr.msra.gmra.mxu1 %v343_v43  ;;  %455 = vmatpush.msra.mxu2 %v422_v48 }
  0x6d   : > { %456 = vmatpush.msra.mxu2 %v421_v49 }
  0xe7   : > { %v397_v51 = vpop.f32.mrf.mxu0 }
  0xe8   : > { %v417_v52 = vpop.f32.mrf.mxu1  ;;  %v398_v53 = vadd.f32 %v726_v50, %v397_v51 }
  0xea   : > { %v418_v54 = vadd.f32 %v417_v52, %v398_v53 }
  0xec   : > { %v420_v55 = vmax.f32 %v418_v54, 0.0 }
  0xee   : > { %457 = vmatmul.f32.vlgmr.msra.gmra.mxu2 %v420_v55 }
 0x171   : > { %v458_v57 = vpop.f32.mrf.mxu2 }
 0x172   : > { %v459_v58 = vadd.f32 %v727_v56, %v458_v57 }
 0x174   : > { %461 = vmax.xlane.f32.xlu0 %v459_v58 }
 0x1e7   : > { %v462_v59 = vpop.xlane.xlu0 %461 }
 0x1e8   : > { %v463_v60 = vsub.f32 %v459_v58, %v462_v59 }
 0x1ea   : > { %v464_v61 = vmul.f32 1.442695, %v463_v60 }
 0x1ec   : > { %728 = vpow2.f32 %v464_v61 }
 0x1f2   : > { %v729_v62 = vpop.eup %728 }
 0x1f3   : > { %466 = vadd.xlane.f32.xlu0 %v729_v62 }
 0x266   : > { %v467_v63 = vpop.xlane.xlu0 %466 }
 0x267   : > { %730 = vrcp.f32 %v467_v63  ;;  %v479_v3 = vand.u32 2147483648, %v467_v63  ;;  %v477_v5 = vand.u32 2147483647, %v467_v63  ;;  %vm473_vm1 = vweird.f32 %v467_v63 }
 0x269   : > { %v480_v7 = vor.u32 1.1754944e-38, %v479_v3  ;;  %vm478_vm3 = vcmp.eq.f32.partialorder %v477_v5, 8.507059e+37 }
 0x26d   : > { %v731_v0 = vpop.eup %730 }
 0x26e   : > { %v469_v1 = vmul.f32 %v731_v0, %v467_v63  ;;  %vm474_vm0 = vweird.f32 %v731_v0 }
 0x26f   : > { %vm475_vm2 = vmor %vm473_vm1, %vm474_vm0 }
 0x270   : > { %v470_v2 = vsub.f32 1.0, %v469_v1 }
 0x272   : > { %v471_v4 = vmul.f32 %v731_v0, %v470_v2 }
 0x274   : > { %v472_v6 = vadd.f32 %v731_v0, %v471_v4 }
 0x276   : > { %v476_v8 = vsel %vm475_vm2, %v731_v0, %v472_v6 }
 0x277   : > { %v481_v10 = vsel %vm478_vm3, %v480_v7, %v476_v8 }
 0x278   : > { %v482_v11 = vmul.f32 %v729_v62, %v481_v10 }
 0x27a   : > { %v484_v12 = vsub.f32 %v482_v11, %v483_v9  ;;  %490 = sbr.rel (%p645_p1) target bundleno = 648 (0x288), region = 64 }
 0x27c   : > { %v485_v13 = vmul.f32 %v484_v12, %v484_v12 }
 0x27e   : > { %486 = vst [vmem:[%s341_s1] sm:$0xff] %v485_v13 }
 0x27f   : > { %v492_v14 = vlaneseq  ;;  %v494_v15 = vstv %s646_s3 }
 0x281   : > { %v493_v16 = vshrl.u32 %v492_v14, 7 }
 0x283   : > { %v495_v17 = vadd.s32 %v494_v15, %v493_v16 }
 0x285   : > { %vm496_vm4 = vcmp.lt.s32.totalorder %v495_v17, 20 }
 0x286   : > { %v499_v18 = vsel %vm496_vm4, %v485_v13, 0.0 }
 0x287   : > { %500 = vst [vmem:[%s341_s1] sm:$0xff] %v499_v18 }
 0x288 PF: > { %s648_s8 = sshll.u32 %s991_s28, 3  ;;  %s514_s18 = sshll.u32 %s341_s1, 4  ;;  %s515_s18 = int_to_ptr.vmem [resolvable:$true] %s514_s18 }
 0x289   : > { %s512_s17 = scalar_lea.hbm %s1165_s6, %s648_s8  ;;  %s502_s26 = scalar_lea.sflag [#allocation4], %s1090_s23 }
 0x28a   : > { %s516_s10 = sshll.u32 %s512_s17, 4  ;;  %s872_s28 = scalar_lea.hbm %s1165_s6, 24  ;;  %s517_s10 = int_to_ptr.hbm [resolvable:$true] %s516_s10 }
 0x28b   : > { %s866_s11 = sshra.s32 %s517_s10, 4  ;;  %s867_s11 = int_to_ptr.hbm [resolvable:$true] %s866_s11 }
 0x28c   : > { %s868_s12 = scalar_lea.hbm %s867_s11, 8  ;;  %p873_p7 = scmp.lt.s32.totalorder %s867_s11, %s1165_s6 }
 0x28d   : > { %p869_p3 = scmp.ne.s32.totalorder %s867_s11, %s868_s12  ;;  %p874_p6 = scmp.lt.s32.totalorder %s872_s28, %s868_s12 }
 0x28f   : > { %p870_p11 = pnand %p869_p3, %p1037_p2  ;;  %p875_p8 = por %p874_p6, %p873_p7 }
 0x291   : > { %p871_p5 = pneg %p870_p11 }
 0x293   : > { %p876_p9 = pnand %p875_p8, %p871_p5 }
 0x295   : > { %879 = shalt.err (!%p876_p9)
}
 0x296   : > { %664 = dma.vmem_to_hbm [thread:$0]  (%p1037_p2), %s515_s18, 128, %s517_s10, %s502_s26  }
 0x297 PF: > { %p689_p10 = scmp.ge.s32.totalorder %s926_s24, 2  ;;  %s528_s23 = sand.u32 1, %s914_s21  }
 0x298   : > { %s529_s7 = scalar_lea.sflag [#allocation4], %s528_s23 }
 0x299   : > { %p681_p12 = pnand %p689_p10, %p1041_p4 }
 0x29b   : > { %p682_p13 = pneg %p681_p12 }
 0x29d   : > { %909 = dma.done.wait (%p682_p13), %s529_s7, 128  }
 0x29e   : > { %911 = vsyncadd (%p682_p13), %s529_s7, 4294967168  ;;  %s1179_s20 = sld [smem:[#allocation15_spill]]  ;;  %p23_p0 = scmp.ge.s32.totalorder %s1009_s16, 5  }
 0x29f   : > { %s1180_s23 = sld [smem:[#allocation16_spill]]  ;;  %s1181_s21 = smov %s918_s22 }
 0x2a0   : > { %s1183_s24 = smov %s1009_s16  ;;  %25 = sbr.rel (!%p23_p0) target bundleno = 11 (0xb), region = 114 }
 0x2a4   : > { %s1182_s22 = smov %s1179_s20 }
 0x2a5   :  { %535 = vsyncpa [#allocation3], 1 }
 0x2a6   :  { %537 = vsyncpa [#allocation3 + $0x1], 1 }
 0x2a7   :  { %538 = vsyncpa [#allocation6], 1 }
 0x2a8   :  { %539 = vsyncpa [#allocation9], 1 }
 0x2a9   :  { %541 = vsyncpa [#allocation9 + $0x1], 1 }
 0x2aa   :  { %542 = vsyncpa [#allocation4], 1 }
 0x2ab   :  { %544 = vsyncpa [#allocation4 + $0x1], 1 }

</bundles_post_ra>
